<compile_context>
chip_gen: v5e
topology: v5e:2x2
jax: 0.10.0
libtpu: 0.0.40
codegen_flags: <defaults>
</compile_context>

<pallas_src>
import math
import jax
import jax.numpy as jnp
from jax.experimental import pallas as pl
from jax.experimental.pallas import tpu as pltpu


def _gcn_body(adj_ref, x_ref, w_ref, b_ref, o_ref):
    # adj_ref: (TB, H, N, N)   -- all heads' adjacency/attention for the block
    # x_ref  : (TB, N, F_in)   -- node features for the block
    # w_ref  : (F_in, F_out)   -- full weight matrix (shared across grid)
    # b_ref  : (1, F_out) or None
    # o_ref  : (TB, N, F_out)  -- output slab for the block
    TB, H, N, _ = adj_ref.shape
    F_in = x_ref.shape[-1]
    F_out = w_ref.shape[1]
    D = F_out // H

    # One wide x@W for the whole batch block:
    # (TB*N, F_in) @ (F_in, F_out) -> (TB*N, F_out).
    x_flat = x_ref[...].reshape(TB * N, F_in)
    support = jnp.dot(x_flat, w_ref[...],
                      preferred_element_type=jnp.float32)       # (TB*N, F_out)
    support = support.reshape(TB, N, F_out)                     # (TB, N, F_out)

    # Fused head loop (static, H small). Each head result is D=128 lanes wide,
    # so the store into o_ref[..., h*D:(h+1)*D] is lane-aligned / unmasked.
    for h in range(H):
        sup_h = support[:, :, h * D:(h + 1) * D]                 # (TB, N, D)
        out_h = jnp.einsum('bij,bjd->bid', adj_ref[:, h], sup_h,
                           preferred_element_type=jnp.float32)   # (TB, N, D)
        if b_ref is not None:
            out_h = out_h + b_ref[0, h * D:(h + 1) * D]          # (D,) bcast
        o_ref[:, :, h * D:(h + 1) * D] = out_h.astype(o_ref.dtype)


def _gcn_kernel(adj_ref, x_ref, w_ref, o_ref):
    _gcn_body(adj_ref, x_ref, w_ref, None, o_ref)


def _gcn_kernel_bias(adj_ref, x_ref, w_ref, b_ref, o_ref):
    _gcn_body(adj_ref, x_ref, w_ref, b_ref, o_ref)


def _choose_batch_block(B, N, target_rows=256):
    """Largest divisor of B such that TB*N <= target_rows MXU rows."""
    tb = max(1, min(B, max(1, target_rows // N)))
    while B % tb != 0:
        tb -= 1
    return tb


def gcn_layer_forward(adj_attn, x, weights, num_heads, bias=None, tb=None):
    """Pallas implementation of GCNLayer.forward.

    adj_attn: (B, H, N, N) float32
    x       : (B, N, F_in) float32
    weights : (F_in, F_out) float32, F_out % num_heads == 0
    bias    : optional (F_out,) float32
    tb      : optional batch-block size (must divide B). On v7x with B>1 pass
              tb <= ceil(B/2) so the "parallel" grid axis spans both TCs.
    returns : (B, N, F_out) float32
    """
    B, H, N, _ = adj_attn.shape
    assert H == num_heads
    F_in = x.shape[-1]
    F_out = weights.shape[-1]
    D = F_out // num_heads
    assert D * num_heads == F_out

    if tb is None:
        tb = _choose_batch_block(B, N)
    assert B % tb == 0, "tb must divide B"
    grid = (B // tb,)

    # Advisory cost hint: x@W + per-head adj matmuls, plus all HBM traffic.
    flops = 2 * B * (N * F_in * F_out + H * N * N * D)
    itemsize = jnp.dtype(x.dtype).itemsize
    bytes_accessed = (adj_attn.size + x.size + weights.size + B * N * F_out) * itemsize
    if bias is not None:
        bytes_accessed += bias.size * itemsize
    cost = pl.CostEstimate(flops=flops, transcendentals=0,
                           bytes_accessed=bytes_accessed)

    in_specs = [
        # all heads' adjacency for the batch block
        pl.BlockSpec((tb, H, N, N), lambda b: (b, 0, 0, 0)),
        # node features for the batch block
        pl.BlockSpec((tb, N, F_in), lambda b: (b, 0, 0)),
        # full weight matrix, shared across all grid steps
        pl.BlockSpec((F_in, F_out), lambda b: (0, 0)),
    ]
    args = (adj_attn, x, weights)
    kernel = _gcn_kernel
    if bias is not None:
        in_specs.append(pl.BlockSpec((1, F_out), lambda b: (0, 0)))
        args = args + (bias.reshape(1, F_out),)
        kernel = _gcn_kernel_bias

    return pl.pallas_call(
        kernel,
        out_shape=jax.ShapeDtypeStruct((B, N, F_out), x.dtype),
        grid_spec=pltpu.PrefetchScalarGridSpec(
            num_scalar_prefetch=0,
            grid=grid,
            in_specs=in_specs,
            # (tb, N, F_out) lane-dense output slab per grid step
            out_specs=pl.BlockSpec((tb, N, F_out), lambda b: (b, 0, 0)),
        ),
        compiler_params=pltpu.CompilerParams(
            dimension_semantics=("parallel",)),
        cost_estimate=cost,
    )(*args)


def _reference(adj_attn, x, weights, num_heads, bias=None):
    B, H, N, _ = adj_attn.shape
    F_out = weights.shape[-1]
    D = F_out // num_heads
    support = jnp.einsum('bnf,fo->bno', x, weights)                       # (B,N,F_out)
    support = support.reshape(B, N, num_heads, D).transpose(0, 2, 1, 3)   # b h n d
    out = jnp.einsum('bhnm,bhmd->bhnd', adj_attn, support)
    out = out.transpose(0, 2, 1, 3).reshape(B, N, F_out)
    if bias is not None:
        out = out + bias
    return out


if __name__ == "__main__":
    # Small shapes consistent with the module's forward.
    B = 2           # batch
    N = 16          # number of graph nodes
    F_in = 32       # input_features
    F_out = 256     # output_features
    H = 2           # num_heads  (per-head dim D = 128, lane-aligned)

    key = jax.random.PRNGKey(0)
    k_adj, k_x, k_w, k_b = jax.random.split(key, 4)

    # Deterministic parameter init matching reset_parameters():
    # uniform(-std, std), std = 1/sqrt(output_features).
    std = 1.0 / math.sqrt(F_out)
    weights = jax.random.uniform(k_w, (F_in, F_out), jnp.float32,
                                 minval=-std, maxval=std)

    x = jax.random.normal(k_x, (B, N, F_in), jnp.float32)
    # adjacency/attention weights, row-normalized like a softmax-ed attention map
    adj_logits = jax.random.normal(k_adj, (B, H, N, N), jnp.float32)
    adj_attn = jax.nn.softmax(adj_logits, axis=-1)

    # Default module config: bias=False.
    out = gcn_layer_forward(adj_attn, x, weights, H, bias=None)
    out = jax.block_until_ready(out)
    ref = _reference(adj_attn, x, weights, H, bias=None)
    assert out.shape == (B, N, F_out)
    assert jnp.allclose(out, ref, atol=1e-5, rtol=1e-5), "mismatch (no bias)"

    # Also exercise the fused-bias path.
    bias = jax.random.uniform(k_b, (F_out,), jnp.float32, minval=-std, maxval=std)
    out_b = gcn_layer_forward(adj_attn, x, weights, H, bias=bias)
    out_b = jax.block_until_ready(out_b)
    ref_b = _reference(adj_attn, x, weights, H, bias=bias)
    assert jnp.allclose(out_b, ref_b, atol=1e-5, rtol=1e-5), "mismatch (bias)"

    # Exercise the multi-step grid path (tb < B), e.g. the v7x two-TC layout.
    out_s = gcn_layer_forward(adj_attn, x, weights, H, bias=None, tb=1)
    out_s = jax.block_until_ready(out_s)
    assert jnp.allclose(out_s, ref, atol=1e-5, rtol=1e-5), "mismatch (tb=1)"

    print("KERNEL_OK")
</pallas_src>

<mosaic_0001>
module attributes {stable_mosaic.version = 11 : i64} {
  func.func @_gcn_kernel(%arg0: i32, %arg1: memref<2x2x16x16xf32, #tpu.memory_space<vmem>>, %arg2: memref<2x16x32xf32, #tpu.memory_space<vmem>>, %arg3: memref<32x256xf32, #tpu.memory_space<vmem>>, %arg4: memref<2x16x256xf32, #tpu.memory_space<vmem>>) attributes {dimension_semantics = [#tpu.dimension_semantics<parallel>], iteration_bounds = array<i64: 1>, scalar_prefetch = 0 : i64, scratch_operands = 0 : i64, tpu.core_type = #tpu.core_type<tc>, window_params = [{transform_indices = @transform_0, window_bounds = array<i64: 2, 2, 16, 16>}, {transform_indices = @transform_1, window_bounds = array<i64: 2, 16, 32>}, {pipeline_mode = #tpu.pipeline_mode<synchronous>, transform_indices = @transform_2, window_bounds = array<i64: 32, 256>}, {transform_indices = @transform_3, window_bounds = array<i64: 2, 16, 256>}]} {
    %c0 = arith.constant 0 : index
    %c0_0 = arith.constant 0 : index
    %c0_1 = arith.constant 0 : index
    %0 = vector.load %arg2[%c0, %c0_0, %c0_1] : memref<2x16x32xf32, #tpu.memory_space<vmem>>, vector<2x16x32xf32>
    %1 = vector.shape_cast %0 : vector<2x16x32xf32> to vector<32x32xf32>
    %c0_2 = arith.constant 0 : index
    %c0_3 = arith.constant 0 : index
    %2 = vector.load %arg3[%c0_2, %c0_3] : memref<32x256xf32, #tpu.memory_space<vmem>>, vector<32x256xf32>
    %cst = arith.constant dense<0.000000e+00> : vector<32x256xf32>
    %3 = tpu.matmul %1, %2, %cst {dimension_numbers = #tpu.dot_dimension_numbers<[1], [0], [0], [1], [0, 0, 1, 1], [], []>} : vector<32x32xf32>, vector<32x256xf32>, vector<32x256xf32> -> vector<32x256xf32>
    %4 = vector.shape_cast %3 : vector<32x256xf32> to vector<2x16x256xf32>
    %5 = vector.extract_strided_slice %4 {offsets = [0, 0, 0], sizes = [2, 16, 128], strides = [1, 1, 1]} : vector<2x16x256xf32> to vector<2x16x128xf32>
    %c0_4 = arith.constant 0 : index
    %c0_5 = arith.constant 0 : index
    %c0_6 = arith.constant 0 : index
    %c0_7 = arith.constant 0 : index
    %6 = vector.load %arg1[%c0_4, %c0_5, %c0_6, %c0_7] : memref<2x2x16x16xf32, #tpu.memory_space<vmem>>, vector<2x1x16x16xf32>
    %7 = vector.shape_cast %6 : vector<2x1x16x16xf32> to vector<2x16x16xf32>
    "tpu.trace_start"() <{level = 10 : i32, message = "bij,bjd->bid"}> : () -> ()
    %cst_8 = arith.constant dense<0.000000e+00> : vector<2x16x128xf32>
    %8 = tpu.matmul %7, %5, %cst_8 {dimension_numbers = #tpu.dot_dimension_numbers<[2], [1], [1], [2], [0, 0, 0, 1, 1, 2], [0], [0]>} : vector<2x16x16xf32>, vector<2x16x128xf32>, vector<2x16x128xf32> -> vector<2x16x128xf32>
    "tpu.trace_stop"() : () -> ()
    %c0_9 = arith.constant 0 : index
    %c0_10 = arith.constant 0 : index
    %c0_11 = arith.constant 0 : index
    %9 = vector.load %arg4[%c0_9, %c0_10, %c0_11] : memref<2x16x256xf32, #tpu.memory_space<vmem>>, vector<2x16x128xf32>
    tpu.vector_store %arg4[%c0_9, %c0_10, %c0_11], %8 {strides = array<i32>} : memref<2x16x256xf32, #tpu.memory_space<vmem>>, vector<2x16x128xf32>,
    %10 = vector.extract_strided_slice %4 {offsets = [0, 0, 128], sizes = [2, 16, 128], strides = [1, 1, 1]} : vector<2x16x256xf32> to vector<2x16x128xf32>
    %c0_12 = arith.constant 0 : index
    %c1 = arith.constant 1 : index
    %c0_13 = arith.constant 0 : index
    %c0_14 = arith.constant 0 : index
    %11 = vector.load %arg1[%c0_12, %c1, %c0_13, %c0_14] : memref<2x2x16x16xf32, #tpu.memory_space<vmem>>, vector<2x1x16x16xf32>
    %12 = vector.shape_cast %11 : vector<2x1x16x16xf32> to vector<2x16x16xf32>
    "tpu.trace_start"() <{level = 10 : i32, message = "bij,bjd->bid"}> : () -> ()
    %cst_15 = arith.constant dense<0.000000e+00> : vector<2x16x128xf32>
    %13 = tpu.matmul %12, %10, %cst_15 {dimension_numbers = #tpu.dot_dimension_numbers<[2], [1], [1], [2], [0, 0, 0, 1, 1, 2], [0], [0]>} : vector<2x16x16xf32>, vector<2x16x128xf32>, vector<2x16x128xf32> -> vector<2x16x128xf32>
    "tpu.trace_stop"() : () -> ()
    %c0_16 = arith.constant 0 : index
    %c0_17 = arith.constant 0 : index
    %c128 = arith.constant 128 : index
    %14 = vector.load %arg4[%c0_16, %c0_17, %c128] : memref<2x16x256xf32, #tpu.memory_space<vmem>>, vector<2x16x128xf32>
    tpu.vector_store %arg4[%c0_16, %c0_17, %c128], %13 {strides = array<i32>} : memref<2x16x256xf32, #tpu.memory_space<vmem>>, vector<2x16x128xf32>,
    return
  }
  func.func @transform_0(%arg0: i32) -> (i32, i32, i32, i32) {
    %c0_i32 = arith.constant 0 : i32
    %c0_i32_0 = arith.constant 0 : i32
    %c0_i32_1 = arith.constant 0 : i32
    %c0_i32_2 = arith.constant 0 : i32
    return %arg0, %c0_i32, %c0_i32_0, %c0_i32_1 : i32, i32, i32, i32
  }
  func.func @transform_1(%arg0: i32) -> (i32, i32, i32) {
    %c0_i32 = arith.constant 0 : i32
    %c0_i32_0 = arith.constant 0 : i32
    %c0_i32_1 = arith.constant 0 : i32
    return %arg0, %c0_i32, %c0_i32_0 : i32, i32, i32
  }
  func.func @transform_2(%arg0: i32) -> (i32, i32) {
    %c0_i32 = arith.constant 0 : i32
    %c0_i32_0 = arith.constant 0 : i32
    %c0_i32_1 = arith.constant 0 : i32
    return %c0_i32, %c0_i32_0 : i32, i32
  }
  func.func @transform_3(%arg0: i32) -> (i32, i32, i32) {
    %c0_i32 = arith.constant 0 : i32
    %c0_i32_0 = arith.constant 0 : i32
    %c0_i32_1 = arith.constant 0 : i32
    return %arg0, %c0_i32, %c0_i32_0 : i32, i32, i32
  }
}

</mosaic_0001>

<bundles_post_ra>
// kernel: tpu_custom_call.1
= control target key start
LH: loop header
LB: loop body
LE: loop exit
PB: predicated region body
PF: predicated region fallthrough
CT: control target
= control target key end

     0   :  { %8 = vsyncpa [#allocation3], 0  ;;  %s479_s0 = inlined_call_operand.hbm [shape: f32[2,2,16,16], index: 0, kind: input, shape index: {}]   ;;  %s480_s1 = inlined_call_operand.hbm [shape: f32[2,16,32], index: 1, kind: input, shape index: {}]   ;;  %s481_s2 = inlined_call_operand.hbm [shape: f32[32,256], index: 2, kind: input, shape index: {}]   ;;  %s482_s3 = inlined_call_operand.hbm [shape: f32[2,16,256], index: 3, kind: output, shape index: {}]  }
   0x1   :  { %9 = vsyncpa [#allocation6], 0 }
   0x2   :  { %10 = vsyncpa [#allocation4], 0  ;;  %s28_s14 = sshll.u32 %s480_s1, 4  ;;  %s425_s15 = smov [#allocation5]   ;;  %s29_s14 = int_to_ptr.hbm [resolvable:$true] %s28_s14 }
   0x3   :  { %s30_s16 = sshll.u32 %s425_s15, 4  ;;  %s15_s19 = sshll.u32 %s479_s0, 4  ;;  %s31_s16 = int_to_ptr.vmem [resolvable:$true] %s30_s16  ;;  %s16_s19 = int_to_ptr.hbm [resolvable:$true] %s15_s19 }
   0x4   :  { %s426_s20 = smov 128   ;;  %s427_s21 = smov 8  }
   0x5   :  { %36 = dma.hbm_to_vmem [thread:$0]  %s29_s14, 512, %s31_s16, [#allocation6], %s426_s20, %s426_s20, %s427_s21  }
   0x6   :  { %s428_s22 = smov [#allocation2]   ;;  %s41_s26 = sshll.u32 %s481_s2, 4  ;;  %s42_s26 = int_to_ptr.hbm [resolvable:$true] %s41_s26 }
   0x7   :  { %s17_s23 = sshll.u32 %s428_s22, 4  ;;  %s429_s1 = smov [#allocation7]   ;;  %s18_s23 = int_to_ptr.vmem [resolvable:$true] %s17_s23 }
   0x8   :  { %23 = dma.hbm_to_vmem [thread:$0]  %s16_s19, 1024, %s18_s23, [#allocation3], %s426_s20, %s426_s20, %s427_s21  }
   0x9   :  { %s43_s27 = sshll.u32 %s429_s1, 4  ;;  %s430_s28 = smov 256   ;;  %s44_s27 = int_to_ptr.vmem [resolvable:$true] %s43_s27 }
   0xa   :  { %s431_s29 = smov 16  }
   0xb   :  { %49 = dma.hbm_to_vmem [thread:$0]  %s42_s26, 1024, %s44_s27, [#allocation6], %s430_s28, %s430_s28, %s431_s29  }
   0xc   :  { %419 = dma.done.wait [#allocation3], 1024  }
   0xd   :  { %420 = vsyncadd [#allocation3], 4294966272 }
   0xe   :  { %421 = dma.done.wait [#allocation6], 1536  }
   0xf   :  { %422 = vsyncadd [#allocation6], 4294965760  ;;  %v72_v0 = vld [vmem:[#allocation7 + $0x30] sm:$0xff]  ;;  %v70_v1 = vld [vmem:[#allocation7 + $0x20] sm:$0xff]  ;;  %vm74_vm0 = vcmask 261120   ;;  %vm149_vm1 = vcmask 130048  }
  0x10   :  { %v73_v2 = vld [vmem:[#allocation7 + $0x38] sm:$0xff]  ;;  %99 = vmatpush.msra.mxu0 %v72_v0  ;;  %v71_v3 = vld [vmem:[#allocation7 + $0x28] sm:$0xff]  ;;  %v68_v4 = vld [vmem:[#allocation7 + $0x10] sm:$0xff]  ;;  %s432_s0 = smov [#allocation8]   ;;  %s285_s5 = sshll.u32 %s482_s3, 4  ;;  %s286_s5 = int_to_ptr.hbm [resolvable:$true] %s285_s5 }
  0x11   :  { %128 = vmatpush.msra.mxu1 %v73_v2  ;;  %v69_v5 = vld [vmem:[#allocation7 + $0x18] sm:$0xff]  ;;  %v66_v6 = vld [vmem:[#allocation7] sm:$0xff]  ;;  %v67_v7 = vld [vmem:[#allocation7 + $0x8] sm:$0xff]  ;;  %s283_s2 = sshll.u32 %s432_s0, 4  ;;  %s284_s2 = int_to_ptr.vmem [resolvable:$true] %s283_s2 }
  0x12   :  { %100 = vmatpush.msra.mxu0 %v70_v1  ;;  %v62_v8 = vld [vmem:[#allocation5] sm:$0xff]  ;;  %v63_v9 = vld [vmem:[#allocation5 + $0x8] sm:$0xff]  ;;  %v64_v10 = vld [vmem:[#allocation5 + $0x10] sm:$0xff] }
  0x13   :  { %129 = vmatpush.msra.mxu1 %v71_v3  ;;  %v65_v11 = vld [vmem:[#allocation5 + $0x18] sm:$0xff]  ;;  %v145_v16 = vld [vmem:[#allocation2] sm:$0xff]  ;;  %v146_v19 = vld [vmem:[#allocation2 + $0x8] sm:$0xff] }
  0x14   :  { %101 = vmatpush.msra.mxu0 %v68_v4  ;;  %v147_v21 = vld [vmem:[#allocation2 + $0x20] sm:$0xff]  ;;  %v213_v23 = vld [vmem:[#allocation2 + $0x10] sm:$0xff]  ;;  %v148_v24 = vld [vmem:[#allocation2 + $0x28] sm:$0xff] }
  0x15   :  { %130 = vmatpush.msra.mxu1 %v69_v5  ;;  %v214_v25 = vld [vmem:[#allocation2 + $0x18] sm:$0xff]  ;;  %v215_v26 = vld [vmem:[#allocation2 + $0x30] sm:$0xff] }
  0x16   :  { %102 = vmatpush.msra.mxu0 %v66_v6  ;;  %v216_v27 = vld [vmem:[#allocation2 + $0x38] sm:$0xff] }
  0x17   :  { %131 = vmatpush.msra.mxu1 %v67_v7  ;;  %299 = vmatmul.msk.f32.vlgmr.msra.gmra.mxu0 %vm74_vm0, %v62_v8 }
  0x18   :  { %303 = vmatmul.msk.f32.vlgmr.msra.gmra.mxu1 %vm74_vm0, %v62_v8 }
  0x1f   :  { %300 = vmatmul.msk.f32.gmra.mxu0 %vm74_vm0, %v63_v9 }
  0x20   :  { %304 = vmatmul.msk.f32.gmra.mxu1 %vm74_vm0, %v63_v9 }
  0x27   :  { %301 = vmatmul.msk.f32.gmra.mxu0 %vm74_vm0, %v64_v10 }
  0x28   :  { %305 = vmatmul.msk.f32.gmra.mxu1 %vm74_vm0, %v64_v10 }
  0x2f   :  { %302 = vmatmul.msk.f32.gmra.mxu0 %vm74_vm0, %v65_v11 }
  0x30   :  { %306 = vmatmul.msk.f32.gmra.mxu1 %vm74_vm0, %v65_v11 }
  0x94   :  { %v104_v12 = vpop.f32.mrf.mxu0 }
  0x95   :  { %v133_v13 = vpop.f32.mrf.mxu1 }
  0x9c   :  { %v107_v14 = vpop.f32.mrf.mxu0 }
  0x9d   :  { %v136_v15 = vpop.f32.mrf.mxu1  ;;  %170 = vmatpush.msra.mxu2 %v107_v14 }
  0x9f   :  { %171 = vmatpush.msra.mxu2 %v104_v12 }
  0xa0   :  { %307 = vmatmul.msk.f32.vlgmr.msra.gmra.mxu2 %vm149_vm1, %v145_v16 }
  0xa1   :  { %237 = vmatpush.msrb.mxu2 %v136_v15 }
  0xa3   :  { %238 = vmatpush.msrb.mxu2 %v133_v13 }
  0xa4   :  { %v110_v17 = vpop.f32.mrf.mxu0 }
  0xa5   :  { %v139_v18 = vpop.f32.mrf.mxu1 }
  0xa8   :  { %308 = vmatmul.msk.f32.gmra.mxu2 %vm149_vm1, %v146_v19 }
  0xac   :  { %v113_v20 = vpop.f32.mrf.mxu0 }
  0xad   :  { %199 = vmatpush.msra.mxu3 %v113_v20  ;;  %v142_v22 = vpop.f32.mrf.mxu1 }
  0xaf   :  { %200 = vmatpush.msra.mxu3 %v110_v17 }
  0xb0   :  { %309 = vmatmul.msk.f32.vlgmr.msra.gmra.mxu3 %vm149_vm1, %v147_v21  ;;  %311 = vmatmul.msk.f32.vlgmr.msrb.gmra.mxu2 %vm149_vm1, %v213_v23 }
  0xb1   :  { %266 = vmatpush.msrb.mxu3 %v142_v22 }
  0xb3   :  { %267 = vmatpush.msrb.mxu3 %v139_v18 }
  0xb8   :  { %310 = vmatmul.msk.f32.gmra.mxu3 %vm149_vm1, %v148_v24  ;;  %312 = vmatmul.msk.f32.gmra.mxu2 %vm149_vm1, %v214_v25 }
  0xc0   :  { %313 = vmatmul.msk.f32.vlgmr.msrb.gmra.mxu3 %vm149_vm1, %v215_v26 }
  0xc8   :  { %314 = vmatmul.msk.f32.gmra.mxu3 %vm149_vm1, %v216_v27 }
 0x123   :  { %v173_v28 = vpop.f32.mrf.mxu2 }
 0x124   :  { %208 = vst [vmem:[#allocation8] sm:$0xff] %v173_v28 }
 0x12b   :  { %v176_v29 = vpop.f32.mrf.mxu2 }
 0x12c   :  { %209 = vst [vmem:[#allocation8 + $0x10] sm:$0xff] %v176_v29 }
 0x133   :  { %v202_v30 = vpop.f32.mrf.mxu3  ;;  %v240_v31 = vpop.f32.mrf.mxu2 }
 0x134   :  { %210 = vst [vmem:[#allocation8 + $0x20] sm:$0xff] %v202_v30 }
 0x135   :  { %275 = vst [vmem:[#allocation8 + $0x8] sm:$0xff] %v240_v31 }
 0x13b   :  { %v205_v32 = vpop.f32.mrf.mxu3  ;;  %v243_v33 = vpop.f32.mrf.mxu2 }
 0x13c   :  { %211 = vst [vmem:[#allocation8 + $0x30] sm:$0xff] %v205_v32 }
 0x13d   :  { %276 = vst [vmem:[#allocation8 + $0x18] sm:$0xff] %v243_v33 }
 0x143   :  { %v269_v34 = vpop.f32.mrf.mxu3 }
 0x144   :  { %277 = vst [vmem:[#allocation8 + $0x28] sm:$0xff] %v269_v34 }
 0x14b   :  { %v272_v35 = vpop.f32.mrf.mxu3 }
 0x14c   :  { %278 = vst [vmem:[#allocation8 + $0x38] sm:$0xff] %v272_v35 }
 0x14d   :  { %291 = dma.vmem_to_hbm [thread:$0]  %s284_s2, 1024, %s286_s5, [#allocation4], %s430_s28, %s430_s28, %s431_s29  }
 0x14e   :  { %423 = dma.done.wait [#allocation4], 1024  }
 0x14f   :  { %424 = vsyncadd [#allocation4], 4294966272 }
 0x150   :  { %296 = vsyncpa [#allocation3], 1 }
 0x151   :  { %297 = vsyncpa [#allocation6], 1 }
 0x152   :  { %298 = vsyncpa [#allocation4], 1 }

</bundles_post_ra>
